<compile_context>
chip_gen: v5e
topology: v5e:2x2
jax: 0.10.0
libtpu: 0.0.40
codegen_flags: <defaults>
</compile_context>

<pallas_src>
import jax
import jax.numpy as jnp
from jax.experimental import pallas as pl
from jax.experimental.pallas import tpu as pltpu


def _round_up(a: int, b: int) -> int:
    return (a + b - 1) // b * b


def _pick_feature_tile(Fp: int, Din: int, budget_bytes: int = 16 * 1024 * 1024) -> int:
    """Largest multiple of 128 that divides Fp and keeps a double-buffered f32
    (Din, tf) expert-weight tile under `budget_bytes`."""
    best = 128
    t = 128
    while t <= Fp:
        if Fp % t == 0 and Din * t * 4 * 2 <= budget_bytes:
            best = t
        t += 128
    return best


def _moe_kernel(x_ref, gw_ref, gb_ref, we_ref, be_ref, o_ref, w_sm_ref):
    """Grid = (token_tiles, feature_tiles, num_expert); expert axis is the reduction axis.

    x_ref   : (tb, Din)   token tile (VMEM-resident across j and e)
    gw_ref  : (Din, E)    gate weight (tiny, resident for the whole grid)
    gb_ref  : (1, E)      gate bias
    we_ref  : (Din, tf)   this expert's weight tile for this feature tile (streamed)
    be_ref  : (1, tf)     this expert's bias tile
    o_ref   : (tb, tf)    output accumulator (resident across the expert axis)
    w_sm_ref: (tb, E)     VMEM scratch holding the softmax gate weights
    """
    e = pl.program_id(2)

    # First expert step for this (token tile, feature tile): compute the gate softmax
    # and zero the resident output accumulator.  Recomputed per (i, j) block so the
    # kernel stays correct under any megacore sharding of the parallel axes; the gate
    # matmul is negligible next to the expert matmuls (E lanes vs tf lanes).
    @pl.when(e == 0)
    def _init():
        x = x_ref[...]                                                      # (tb, Din)
        logits = jnp.dot(x, gw_ref[...],
                         preferred_element_type=jnp.float32) + gb_ref[...]  # (tb, E)
        m = jnp.max(logits, axis=-1, keepdims=True)
        p = jnp.exp(logits - m)
        w_sm_ref[...] = p / jnp.sum(p, axis=-1, keepdims=True)              # (tb, E)
        o_ref[...] = jnp.zeros_like(o_ref)

    # This expert's lane-dense output tile: no (B, E, F) reshape, no middle-axis
    # reduction; tf is a multiple of 128 so the store is an unmasked vst.
    eo = jnp.dot(x_ref[...], we_ref[...],
                 preferred_element_type=jnp.float32) + be_ref[...]          # (tb, tf)

    # Extract softmax column e without a dynamic lane slice: masked lane-sum (E lanes).
    w_all = w_sm_ref[...]                                                   # (tb, E)
    sel = jax.lax.broadcasted_iota(jnp.int32, w_all.shape, 1) == e
    w_e = jnp.sum(jnp.where(sel, w_all, 0.0), axis=-1, keepdims=True)       # (tb, 1)

    o_ref[...] += w_e * eo


def prepare_moe_params(gate_w, gate_b, expert_w, expert_b):
    """One-time parameter layout (call OUTSIDE the hot path).

    gate_w   : (Din, E)     (already transposed vs. torch nn.Linear)
    gate_b   : (E,)
    expert_w : (E, Din, F)  (already transposed vs. torch nn.Linear)
    expert_b : (E, F)
    Returns (gate_w, gate_b_2d, expert_w_padded, expert_b_padded) with the expert
    output dimension padded to a multiple of 128 (lane-dense tiles / stores).
    """
    E, Din, F = expert_w.shape
    Fp = _round_up(F, 128)
    ew_p = jnp.pad(expert_w, ((0, 0), (0, 0), (0, Fp - F)))                 # (E, Din, Fp)
    eb_p = jnp.pad(expert_b, ((0, 0), (0, Fp - F))).reshape(E, 1, Fp)       # (E, 1, Fp)
    gb_2d = gate_b.reshape(1, E)
    return gate_w, gb_2d, ew_p, eb_p


def basic_moe_pallas(x, gate_w, gate_b2, expert_w_p, expert_b_p, *, feature_out):
    """x: (B, Din) -> (B, feature_out), using the pre-laid-out params."""
    B, Din = x.shape
    E, _, Fp = expert_w_p.shape

    # Token tiling: keep the whole (small) batch in one block when possible.
    tb = min(256, _round_up(B, 8))
    Bp = _round_up(B, tb)
    x_p = jnp.pad(x, ((0, Bp - B), (0, 0))) if Bp != B else x

    # Feature tiling: lane-dense tile that keeps the per-expert weight tile VMEM-friendly.
    tf = _pick_feature_tile(Fp, Din)
    grid = (Bp // tb, Fp // tf, E)

    # Raise the scoped VMEM limit, but never above what the chip physically has
    # (v7x: 64 MiB per TensorCore vs. 128 MiB on v5e/v6e).
    try:
        vmem_cap = pltpu.get_tpu_info().vmem_capacity_bytes
        vmem_limit = min(64 * 1024 * 1024, int(vmem_cap * 3 // 4))
    except Exception:  # pragma: no cover - fall back to the v6e default
        vmem_limit = 32 * 1024 * 1024

    out = pl.pallas_call(
        _moe_kernel,
        out_shape=jax.ShapeDtypeStruct((Bp, Fp), jnp.float32),
        grid_spec=pltpu.PrefetchScalarGridSpec(
            num_scalar_prefetch=0,
            grid=grid,
            in_specs=[
                # token tile: block index constant across j and e -> fetched once per i
                pl.BlockSpec((tb, Din), lambda i, j, e: (i, 0)),
                # gate weight/bias: tiny, resident for the whole grid
                pl.BlockSpec((Din, E), lambda i, j, e: (0, 0)),
                pl.BlockSpec((1, E), lambda i, j, e: (0, 0)),
                # per-expert weight / bias tiles: streamed & double-buffered along e
                pl.BlockSpec((None, Din, tf), lambda i, j, e: (e, 0, j)),
                pl.BlockSpec((None, 1, tf), lambda i, j, e: (e, 0, j)),
            ],
            out_specs=pl.BlockSpec((tb, tf), lambda i, j, e: (i, j)),
            scratch_shapes=[pltpu.VMEM((tb, E), jnp.float32)],
        ),
        compiler_params=pltpu.CompilerParams(
            dimension_semantics=("parallel", "parallel", "arbitrary"),
            vmem_limit_bytes=vmem_limit,
        ),
    )(x_p, gate_w, gate_b2, expert_w_p, expert_b_p)

    return out[:B, :feature_out]


def basic_moe_ref(x, gate_w, gate_b, expert_w, expert_b):
    """Plain-JAX reference mirroring the PyTorch forward."""
    logits = x @ gate_w + gate_b                                     # (B, E)
    w = jax.nn.softmax(logits, axis=1)                               # (B, E)
    eo = jnp.einsum("bd,edf->bef", x, expert_w) + expert_b[None]     # (B, E, F)
    return jnp.einsum("be,bef->bf", w, eo)                           # (B, F)


if __name__ == "__main__":
    B, feature_in, feature_out, num_expert = 8, 32, 64, 4

    key = jax.random.PRNGKey(0)
    kx, kgw, kgb, kew, keb = jax.random.split(key, 5)

    x = jax.random.normal(kx, (B, feature_in), dtype=jnp.float32)
    # Parameters stored transposed vs. torch nn.Linear weights.
    gate_w = jax.random.normal(kgw, (feature_in, num_expert), dtype=jnp.float32) * 0.1
    gate_b = jax.random.normal(kgb, (num_expert,), dtype=jnp.float32) * 0.1
    expert_w = jax.random.normal(
        kew, (num_expert, feature_in, feature_out), dtype=jnp.float32) * 0.1
    expert_b = jax.random.normal(keb, (num_expert, feature_out), dtype=jnp.float32) * 0.1

    # One-time layout (outside the hot path), then the gridded Pallas kernel.
    params = prepare_moe_params(gate_w, gate_b, expert_w, expert_b)
    out = basic_moe_pallas(x, *params, feature_out=feature_out)
    out = jax.block_until_ready(out)

    ref = basic_moe_ref(x, gate_w, gate_b, expert_w, expert_b)
    assert out.shape == (B, feature_out)
    assert jnp.allclose(out, ref, atol=1e-4, rtol=1e-4), "mismatch vs reference"

    print("KERNEL_OK")
</pallas_src>

<mosaic_0001>
module attributes {stable_mosaic.version = 11 : i64} {
  func.func @_moe_kernel(%arg0: i32, %arg1: i32, %arg2: i32, %arg3: memref<8x32xf32, #tpu.memory_space<vmem>>, %arg4: memref<32x4xf32, #tpu.memory_space<vmem>>, %arg5: memref<1x4xf32, #tpu.memory_space<vmem>>, %arg6: memref<1x32x128xf32, #tpu.memory_space<vmem>>, %arg7: memref<1x1x128xf32, #tpu.memory_space<vmem>>, %arg8: memref<8x128xf32, #tpu.memory_space<vmem>>, %arg9: memref<8x4xf32, #tpu.memory_space<vmem>>) attributes {dimension_semantics = [#tpu.dimension_semantics<parallel>, #tpu.dimension_semantics<parallel>, #tpu.dimension_semantics<arbitrary>], iteration_bounds = array<i64: 1, 1, 4>, scalar_prefetch = 0 : i64, scratch_operands = 1 : i64, tpu.core_type = #tpu.core_type<tc>, window_params = [{transform_indices = @transform_0, window_bounds = array<i64: 8, 32>}, {pipeline_mode = #tpu.pipeline_mode<synchronous>, transform_indices = @transform_1, window_bounds = array<i64: 32, 4>}, {pipeline_mode = #tpu.pipeline_mode<synchronous>, transform_indices = @transform_2, window_bounds = array<i64: 1, 4>}, {transform_indices = @transform_3, window_bounds = array<i64: 1, 32, 128>}, {transform_indices = @transform_4, window_bounds = array<i64: 1, 1, 128>}, {transform_indices = @transform_5, window_bounds = array<i64: 8, 128>}]} {
    %c0_i32 = arith.constant 0 : i32
    %0 = arith.cmpi eq, %arg2, %c0_i32 : i32
    %1 = arith.extui %0 : i1 to i32
    %c0_i32_0 = arith.constant 0 : i32
    %2 = arith.cmpi ne, %1, %c0_i32_0 : i32
    scf.if %2 {
      %c0_16 = arith.constant 0 : index
      %c0_17 = arith.constant 0 : index
      %24 = vector.load %arg3[%c0_16, %c0_17] : memref<8x32xf32, #tpu.memory_space<vmem>>, vector<8x32xf32>
      %c0_18 = arith.constant 0 : index
      %c0_19 = arith.constant 0 : index
      %25 = vector.load %arg4[%c0_18, %c0_19] : memref<32x4xf32, #tpu.memory_space<vmem>>, vector<32x4xf32>
      %cst_20 = arith.constant dense<0.000000e+00> : vector<8x4xf32>
      %26 = tpu.matmul %24, %25, %cst_20 {dimension_numbers = #tpu.dot_dimension_numbers<[1], [0], [0], [1], [0, 0, 1, 1], [], []>} : vector<8x32xf32>, vector<32x4xf32>, vector<8x4xf32> -> vector<8x4xf32>
      %c0_21 = arith.constant 0 : index
      %c0_22 = arith.constant 0 : index
      %27 = vector.load %arg5[%c0_21, %c0_22] : memref<1x4xf32, #tpu.memory_space<vmem>>, vector<1x4xf32>
      %28 = vector.broadcast %27 : vector<1x4xf32> to vector<8x4xf32>
      %29 = arith.addf %26, %28 : vector<8x4xf32>
      %cst_23 = arith.constant dense<0xFF800000> : vector<8xf32>
      %30 = vector.multi_reduction <maximumf>, %29, %cst_23 [1] : vector<8x4xf32> to vector<8xf32>
      %31 = vector.shape_cast %30 : vector<8xf32> to vector<8x1xf32>
      %32 = vector.broadcast %31 : vector<8x1xf32> to vector<8x4xf32>
      %33 = arith.subf %29, %32 : vector<8x4xf32>
      %34 = math.exp %33 : vector<8x4xf32>
      %cst_24 = arith.constant dense<0.000000e+00> : vector<8xf32>
      %35 = vector.multi_reduction <add>, %34, %cst_24 [1] : vector<8x4xf32> to vector<8xf32>
      %36 = vector.shape_cast %35 : vector<8xf32> to vector<8x1xf32>
      %37 = vector.broadcast %36 : vector<8x1xf32> to vector<8x4xf32>
      %38 = arith.divf %34, %37 : vector<8x4xf32>
      %c0_25 = arith.constant 0 : index
      %c0_26 = arith.constant 0 : index
      %39 = vector.load %arg9[%c0_25, %c0_26] : memref<8x4xf32, #tpu.memory_space<vmem>>, vector<8x4xf32>
      tpu.vector_store %arg9[%c0_25, %c0_26], %38 {strides = array<i32>} : memref<8x4xf32, #tpu.memory_space<vmem>>, vector<8x4xf32>,
      %cst_27 = arith.constant 0.000000e+00 : f32
      %40 = vector.broadcast %cst_27 : f32 to vector<8x128xf32>
      %c0_28 = arith.constant 0 : index
      %c0_29 = arith.constant 0 : index
      %41 = vector.load %arg8[%c0_28, %c0_29] : memref<8x128xf32, #tpu.memory_space<vmem>>, vector<8x128xf32>
      tpu.vector_store %arg8[%c0_28, %c0_29], %40 {strides = array<i32>} : memref<8x128xf32, #tpu.memory_space<vmem>>, vector<8x128xf32>,
    } else {
    }
    %c0 = arith.constant 0 : index
    %c0_1 = arith.constant 0 : index
    %3 = vector.load %arg3[%c0, %c0_1] : memref<8x32xf32, #tpu.memory_space<vmem>>, vector<8x32xf32>
    %c0_2 = arith.constant 0 : index
    %c0_3 = arith.constant 0 : index
    %c0_4 = arith.constant 0 : index
    %4 = vector.load %arg6[%c0_2, %c0_3, %c0_4] : memref<1x32x128xf32, #tpu.memory_space<vmem>>, vector<1x32x128xf32>
    %5 = vector.shape_cast %4 : vector<1x32x128xf32> to vector<32x128xf32>
    %cst = arith.constant dense<0.000000e+00> : vector<8x128xf32>
    %6 = tpu.matmul %3, %5, %cst {dimension_numbers = #tpu.dot_dimension_numbers<[1], [0], [0], [1], [0, 0, 1, 1], [], []>} : vector<8x32xf32>, vector<32x128xf32>, vector<8x128xf32> -> vector<8x128xf32>
    %c0_5 = arith.constant 0 : index
    %c0_6 = arith.constant 0 : index
    %c0_7 = arith.constant 0 : index
    %7 = vector.load %arg7[%c0_5, %c0_6, %c0_7] : memref<1x1x128xf32, #tpu.memory_space<vmem>>, vector<1x1x128xf32>
    %8 = vector.shape_cast %7 : vector<1x1x128xf32> to vector<1x128xf32>
    %9 = vector.broadcast %8 : vector<1x128xf32> to vector<8x128xf32>
    %10 = arith.addf %6, %9 : vector<8x128xf32>
    %c0_8 = arith.constant 0 : index
    %c0_9 = arith.constant 0 : index
    %11 = vector.load %arg9[%c0_8, %c0_9] : memref<8x4xf32, #tpu.memory_space<vmem>>, vector<8x4xf32>
    %12 = tpu.iota {dimensions = array<i32: 1>} : vector<8x4xi32>
    %13 = vector.broadcast %arg2 : i32 to vector<8x4xi32>
    %14 = arith.cmpi eq, %12, %13 : vector<8x4xi32>
    %cst_10 = arith.constant 0.000000e+00 : f32
    %15 = vector.broadcast %cst_10 : f32 to vector<8x4xf32>
    %16 = arith.select %14, %11, %15 : vector<8x4xi1>, vector<8x4xf32>
    %cst_11 = arith.constant dense<0.000000e+00> : vector<8xf32>
    %17 = vector.multi_reduction <add>, %16, %cst_11 [1] : vector<8x4xf32> to vector<8xf32>
    %18 = vector.shape_cast %17 : vector<8xf32> to vector<8x1xf32>
    %c0_12 = arith.constant 0 : index
    %c0_13 = arith.constant 0 : index
    %19 = vector.load %arg8[%c0_12, %c0_13] : memref<8x128xf32, #tpu.memory_space<vmem>>, vector<8x128xf32>
    %20 = vector.broadcast %18 : vector<8x1xf32> to vector<8x128xf32>
    %21 = arith.mulf %20, %10 : vector<8x128xf32>
    %22 = arith.addf %19, %21 : vector<8x128xf32>
    %c0_14 = arith.constant 0 : index
    %c0_15 = arith.constant 0 : index
    %23 = vector.load %arg8[%c0_14, %c0_15] : memref<8x128xf32, #tpu.memory_space<vmem>>, vector<8x128xf32>
    tpu.vector_store %arg8[%c0_14, %c0_15], %22 {strides = array<i32>} : memref<8x128xf32, #tpu.memory_space<vmem>>, vector<8x128xf32>,
    return
  }
  func.func @transform_0(%arg0: i32, %arg1: i32, %arg2: i32) -> (i32, i32) {
    %c0_i32 = arith.constant 0 : i32
    %c0_i32_0 = arith.constant 0 : i32
    return %arg0, %c0_i32 : i32, i32
  }
  func.func @transform_1(%arg0: i32, %arg1: i32, %arg2: i32) -> (i32, i32) {
    %c0_i32 = arith.constant 0 : i32
    %c0_i32_0 = arith.constant 0 : i32
    %c0_i32_1 = arith.constant 0 : i32
    return %c0_i32, %c0_i32_0 : i32, i32
  }
  func.func @transform_2(%arg0: i32, %arg1: i32, %arg2: i32) -> (i32, i32) {
    %c0_i32 = arith.constant 0 : i32
    %c0_i32_0 = arith.constant 0 : i32
    %c0_i32_1 = arith.constant 0 : i32
    return %c0_i32, %c0_i32_0 : i32, i32
  }
  func.func @transform_3(%arg0: i32, %arg1: i32, %arg2: i32) -> (i32, i32, i32) {
    %c0_i32 = arith.constant 0 : i32
    %c0_i32_0 = arith.constant 0 : i32
    return %arg2, %c0_i32, %arg1 : i32, i32, i32
  }
  func.func @transform_4(%arg0: i32, %arg1: i32, %arg2: i32) -> (i32, i32, i32) {
    %c0_i32 = arith.constant 0 : i32
    %c0_i32_0 = arith.constant 0 : i32
    return %arg2, %c0_i32, %arg1 : i32, i32, i32
  }
  func.func @transform_5(%arg0: i32, %arg1: i32, %arg2: i32) -> (i32, i32) {
    %c0_i32 = arith.constant 0 : i32
    return %arg0, %arg1 : i32, i32
  }
}

</mosaic_0001>

<bundles_post_ra>
// kernel: tpu_custom_call.1
= control target key start
LH: loop header
LB: loop body
LE: loop exit
PB: predicated region body
PF: predicated region fallthrough
CT: control target
= control target key end

     0   :  { %10 = vsyncpa [#allocation4], 0  ;;  %s892_s0 = inlined_call_operand.vmem [shape: f32[8,32], index: 0, kind: input, shape index: {}]   ;;  %s893_s1 = inlined_call_operand.vmem [shape: f32[32,4], index: 1, kind: input, shape index: {}]   ;;  %s894_s2 = inlined_call_operand.vmem [shape: f32[1,4], index: 2, kind: input, shape index: {}]   ;;  %s895_s3 = inlined_call_operand.hbm [shape: f32[4,32,128], index: 3, kind: input, shape index: {}]   ;;  %s896_s4 = inlined_call_operand.vmem [shape: f32[4,1,128], index: 4, kind: input, shape index: {}]   ;;  %s897_s5 = inlined_call_operand.hbm [shape: f32[8,128], index: 5, kind: output, shape index: {}]  }
   0x1   :  { %12 = vsyncpa [#allocation4 + $0x1], 0 }
   0x2   :  { %13 = vsyncpa [#allocation5], 0  ;;  %s757_s18 = smov 0   ;;  %s759_s19 = smov 0  }
   0x3   :  { %s761_s20 = smov 0   ;;  %s763_s21 = smov 0  }
   0x4   :  { %s765_s22 = smov 0   ;;  %s767_s23 = smov 0  }
   0x5 LB: > { %s521_s24 = sadd.s32 4294967295, %s721_s23   ;;  %s31_s25 = sadd.s32 1, %s717_s22  ;;  %s721_s23 = sphi %s767_s23, %s19_s23   ;;  %s717_s22 = sphi %s765_s22, %s904_s22   ;;  %s713_s21 = sphi %s763_s21, %s903_s21   ;;  %s709_s20 = sphi %s761_s20, %s902_s20   ;;  %s705_s19 = sphi %s759_s19, %s901_s19   ;;  %s701_s18 = sphi %s757_s18, %s900_s18  }
   0x6   : > { %p32_p0 = scmp.ge.s32.totalorder %s31_s25, 4  ;;  %s115_s26 = sadd.s32 1, %s709_s20 }
   0x7   : > { %p122_p1 = scmp.ne.s32.totalorder %s709_s20, %s705_s19  ;;  %p123_p2 = scmp.eq.s32.totalorder %s721_s23, 0 }
   0x8   : > { %s906_s25 = smov (%p32_p0, %s31_s25), 0  ;;  %p128_p4 = scmp.ne.s32.totalorder %s705_s19, %s701_s18 }
   0x9   : > { %p793_p3 = por %p123_p2, %p122_p1  ;;  %s110_s28 = ssub.s32 %s717_s22, %s906_s25 }
   0xa   : > { %p129_p5 = scmp.eq.s32.totalorder %s521_s24, 0  ;;  %p113_p6 = scmp.eq.s32.totalorder %s110_s28, 0 }
   0xb   : > { %p548_p8 = scmp.lt.s32.totalorder %s721_s23, 4  ;;  %s221_s6 = sand.u32 1, %s709_s20  }
   0xc   : > { %p802_p7 = por %p129_p5, %p128_p4  ;;  %s537_s7 = sshll.u32 %s717_s22, 5 }
   0xd   : > { %s808_s30 = scalar_select %p113_p6, %s709_s20, %s115_s26  }
   0xe   : > { %s525_s8 = sshll.u32 %s221_s6, 5  ;;  %s231_s11 = scalar_lea.hbm %s895_s3, %s537_s7 }
   0xf   : > { %s232_s12 = sshll.u32 %s231_s11, 4  ;;  %s225_s13 = scalar_lea.vmem [#allocation3], %s525_s8  ;;  %s233_s12 = int_to_ptr.hbm [resolvable:$true] %s232_s12 }
  0x10   : > { %s234_s14 = sshll.u32 %s225_s13, 4  ;;  %p545_p9 = pnand %p548_p8, %p793_p3  ;;  %s235_s14 = int_to_ptr.vmem [resolvable:$true] %s234_s14 }
  0x11   : > { %p528_p10 = scmp.ge.s32.totalorder %s721_s23, 1  ;;  %p251_p11 = scmp.lt.s32.totalorder %s721_s23, 5 }
  0x12   : > { %s222_s15 = scalar_lea.sflag [#allocation4], %s221_s6  ;;  %s723_s16 = smov 128  }
  0x13   : > { %s724_s17 = smov 8   ;;  %p252_p12 = pnand %p528_p10, %p251_p11 }
  0x14   : > { %547 = dma.hbm_to_vmem [thread:$0]  (!%p545_p9), %s233_s12, 512, %s235_s14, %s222_s15, %s723_s16, %s723_s16, %s724_s17  }
  0x15   : > { %255 = sbr.rel (%p252_p12) target bundleno = 580 (0x244), region = 40  ;;  %s257_s18 = sand.u32 (!%p252_p12), 1, %s705_s19  }
  0x16   : > { %s529_s26 = sshll.u32 (!%p252_p12), %s257_s18, 5  ;;  %s258_s28 = scalar_lea.sflag (!%p252_p12), [#allocation4], %s257_s18 }
  0x17   : > { %s820_s7 = scalar_lea.vmem (!%p252_p12), [#allocation3], %s529_s26 }
  0x1a   : > { %692 = dma.done.wait (%p802_p7), %s258_s28, 512  }
  0x1b   : > { %694 = vsyncadd (%p802_p7), %s258_s28, 4294966784  ;;  %p298_p13 = scmp.lt.s32.totalorder %s713_s21, 3  ;;  %p530_p0 = scmp.ne.s32.totalorder %s713_s21, 0 }
  0x1d   : > { %s828_s27 = scalar_select %p298_p13, %s713_s21, 3 }
  0x1e   : > { %307 = sbr.rel (%p530_p0) target bundleno = 436 (0x1b4), region = 48 }
  0x1f   : > { %s303_s9 = scalar_lea.vmem %s896_s4, %s828_s27 }
  0x23   : > { %v312_v0 = vld [vmem:[%s893_s1 + $0x18] sm:$0xff]  ;;  %v311_v1 = vld [vmem:[%s893_s1 + $0x10] sm:$0xff]  ;;  %v310_v2 = vld [vmem:[%s893_s1 + $0x8] sm:$0xff]  ;;  %vm317_vm0 = vcmask 261120   ;;  %vm341_vm1 = vcmask 31744   ;;  %v725_v14 = vmov 0.0  }
  0x24   : > { %333 = vmatpush.msra.mxu0 %v312_v0  ;;  %v309_v3 = vld [vmem:[%s893_s1] sm:$0xff]  ;;  %367 = vst [vmem:[#allocation6] sm:$0xff] %v725_v14 }
  0x25   : > { %v308_v4 = vld [vmem:[%s892_s0] sm:$0xff] }
  0x26   : > { %334 = vmatpush.msra.mxu0 %v311_v1  ;;  %v603_v5 = vld [vmem:[%s894_s2] ss:$0 sm:$0xff] }
  0x28   : > { %335 = vmatpush.msra.mxu0 %v310_v2 }
  0x2a   : > { %336 = vmatpush.msra.mxu0 %v309_v3 }
  0x2b   : > { %531 = vmatmul.msk.f32.vlgmr.msra.gmra.mxu0 %vm317_vm0, %v308_v4 }
  0xa8   : > { %v338_v6 = vpop.f32.mrf.mxu0 }
  0xa9   : > { %v339_v7 = vadd.f32 %v603_v5, %v338_v6 }
  0xab   : > { %v342_v8 = vsel %vm341_vm1, %v339_v7, -inf }
  0xac   : > { %343 = vmax.xlane.f32.xlu0 %v342_v8 }
 0x11f   : > { %v344_v9 = vpop.xlane.xlu0 %343 }
 0x120   : > { %v345_v10 = vsub.f32 %v339_v7, %v344_v9 }
 0x122   : > { %v346_v11 = vmul.f32 1.442695, %v345_v10 }
 0x124   : > { %604 = vpow2.f32 %v346_v11 }
 0x12a   : > { %v605_v12 = vpop.eup %604 }
 0x12b   : > { %v348_v13 = vsel %vm341_vm1, %v605_v12, 0.0 }
 0x12c   : > { %349 = vadd.xlane.f32.xlu0 %v348_v13 }
 0x19f   : > { %v350_v15 = vpop.xlane.xlu0 %349 }
 0x1a0   : > { %606 = vrcp.f32 %v350_v15  ;;  %v362_v19 = vand.u32 2147483648, %v350_v15  ;;  %v360_v21 = vand.u32 2147483647, %v350_v15  ;;  %vm356_vm3 = vweird.f32 %v350_v15 }
 0x1a2   : > { %v363_v23 = vor.u32 1.1754944e-38, %v362_v19  ;;  %vm361_vm5 = vcmp.eq.f32.partialorder %v360_v21, 8.507059e+37 }
 0x1a6   : > { %v607_v16 = vpop.eup %606 }
 0x1a7   : > { %v352_v17 = vmul.f32 %v607_v16, %v350_v15  ;;  %vm357_vm2 = vweird.f32 %v607_v16 }
 0x1a8   : > { %vm358_vm4 = vmor %vm356_vm3, %vm357_vm2 }
 0x1a9   : > { %v353_v18 = vsub.f32 1.0, %v352_v17 }
 0x1ab   : > { %v354_v20 = vmul.f32 %v607_v16, %v353_v18 }
 0x1ad   : > { %v355_v22 = vadd.f32 %v607_v16, %v354_v20 }
 0x1af   : > { %v359_v24 = vsel %vm358_vm4, %v607_v16, %v355_v22 }
 0x1b0   : > { %v364_v25 = vsel %vm361_vm5, %v363_v23, %v359_v24 }
 0x1b1   : > { %v365_v26 = vmul.f32 %v605_v12, %v364_v25 }
 0x1b3   : > { %366 = vst.msk [vmem:[#allocation2] sm:$0xff] %vm341_vm1, %v365_v26 }
 0x1b4 PF: > { %v372_v27 = vld [vmem:[%s820_s7 + $0x18] sm:$0xff]  ;;  %v371_v28 = vld [vmem:[%s820_s7 + $0x10] sm:$0xff]  ;;  %v402_v29 = vlaneseq  ;;  %v404_v30 = vstv %s713_s21  ;;  %v370_v31 = vld [vmem:[%s820_s7 + $0x8] sm:$0xff]  ;;  %vm407_vm6 = vcmask 31744   ;;  %vm377_vm8 = vcmask 261120   ;;  %s426_s13 = sshll.u32 %s897_s5, 4  ;;  %s427_s13 = int_to_ptr.hbm [resolvable:$true] %s426_s13 }
 0x1b5   : > { %393 = vmatpush.msra.mxu0 %v372_v27  ;;  %v369_v34 = vld [vmem:[%s820_s7] sm:$0xff]  ;;  %v368_v35 = vld [vmem:[%s892_s0] sm:$0xff]  ;;  %s726_s7 = smov [#allocation6]   ;;  %p549_p1 = scmp.eq.s32.totalorder %s521_s24, 3 }
 0x1b6   : > { %v403_v33 = vand.u32 127, %v402_v29  ;;  %v608_v38 = vld [vmem:[%s303_s9] ss:$0 sm:$0xff]  ;;  %v411_v42 = vld [vmem:[#allocation6] sm:$0xff]  ;;  %s424_s11 = sshll.u32 %s726_s7, 4  ;;  %s425_s11 = int_to_ptr.vmem [resolvable:$true] %s424_s11 }
 0x1b7   : > { %394 = vmatpush.msra.mxu0 %v371_v28 }
 0x1b8   : > { %vm405_vm7 = vcmp.eq.s32.totalorder %v403_v33, %v404_v30 }
 0x1b9   : > { %395 = vmatpush.msra.mxu0 %v370_v31 }
 0x1ba   : > { %v401_v32 = vld [vmem:[#allocation2] sm:$0xff] }
 0x1bb   : > { %v406_v36 = vsel %vm405_vm7, %v401_v32, 0.0  ;;  %396 = vmatpush.msra.mxu0 %v369_v34 }
 0x1bc   : > { %v408_v37 = vsel %vm407_vm6, %v406_v36, 0.0  ;;  %532 = vmatmul.msk.f32.vlgmr.msra.gmra.mxu0 %vm377_vm8, %v368_v35 }
 0x1bd   : > { %409 = vadd.xlane.f32.xlu0 %v408_v37 }
 0x230   : > { %v410_v40 = vpop.xlane.xlu0 %409 }
 0x239   : > { %v398_v39 = vpop.f32.mrf.mxu0 }
 0x23a   : > { %v399_v41 = vadd.f32 %v608_v38, %v398_v39 }
 0x23c   : > { %v412_v43 = vmul.f32 %v410_v40, %v399_v41 }
 0x23e   : > { %v413_v44 = vadd.f32 %v412_v43, %v411_v42 }
 0x240   : > { %414 = vst [vmem:[#allocation6] sm:$0xff] %v413_v44 }
 0x241   : > { %541 = dma.vmem_to_hbm [thread:$0]  (%p549_p1), %s425_s11, 128, %s427_s13, [#allocation5]  }
 0x242   : > { %696 = dma.done.wait (%p549_p1), [#allocation5], 128  }
 0x243   : > { %698 = vsyncadd (%p549_p1), [#allocation5], 4294967168 }
 0x244 PF: > { %s19_s23 = sadd.s32 1, %s721_s23   ;;  %s900_s18 = smov %s705_s19 }
 0x245   : > { %p16_p2 = scmp.ge.s32.totalorder %s19_s23, 6   ;;  %s901_s19 = smov %s709_s20 }
 0x246   : > { %s902_s20 = smov %s808_s30  ;;  %s903_s21 = smov %s717_s22 }
 0x247   : > { %s904_s22 = smov %s906_s25  ;;  %18 = sbr.rel (!%p16_p2) target bundleno = 5 (0x5), region = 88 }
 0x24c   :  { %440 = vsyncpa [#allocation4], 1 }
 0x24d   :  { %442 = vsyncpa [#allocation4 + $0x1], 1 }
 0x24e   :  { %443 = vsyncpa [#allocation5], 1 }
 0x24f   :  { %445 = vsyncpa [#allocation5 + $0x1], 1 }

</bundles_post_ra>
